<compile_context>
chip_gen: v6e
topology: v6e:2x2x1
jax: 0.10.0
libtpu: 0.0.40
codegen_flags: <defaults>
</compile_context>

<pallas_src>
import functools
import math

import jax
import jax.numpy as jnp
from jax import lax
from jax.experimental import pallas as pl
from jax.experimental.pallas import tpu as pltpu


# ---------------------------------------------------------------------------
# helpers
# ---------------------------------------------------------------------------
def _round_up(x, m):
    return ((x + m - 1) // m) * m


def _pick_tile(dim, multiple, target):
    """Largest tile <= target that divides `dim` and is a multiple of
    `multiple`; falls back to the full dimension (always a legal block)."""
    if dim <= target:
        return dim
    d = (target // multiple) * multiple
    while d >= multiple:
        if dim % d == 0:
            return d
        d -= multiple
    return dim


def _pick_head_block(num_heads, head_dim):
    """Heads per attention grid step: fill ~256-deep MXU contraction."""
    target = max(1, min(num_heads, 256 // max(head_dim, 1), 8))
    for hb in range(target, 0, -1):
        if num_heads % hb == 0:
            return hb
    return 1


def _nbytes(shape, dtype):
    return math.prod(shape) * jnp.dtype(dtype).itemsize


def _vmem_cap_bytes():
    try:
        info = pltpu.get_tpu_info()
        cap = getattr(info, "vmem_capacity_bytes", None)
        if cap:
            return int(cap)
    except Exception:
        pass
    return 64 << 20   # conservative fallback = v7x physical VMEM


def _vmem_limit(block_bytes, scratch_bytes=0):
    # double-buffered pipelined blocks + scratch/intermediates + headroom,
    # clamped to 85% of the physical VMEM of the device we are compiling for.
    est = 2 * block_bytes + scratch_bytes + (2 << 20)
    cap = int(_vmem_cap_bytes() * 0.85)
    return int(min(max(est, 16 << 20), cap))


# ---------------------------------------------------------------------------
# Kernel 1: tiled linear projection  y = x @ w_t + b  written in a grouped
# (N // group_width, M, group_width) layout so the attention kernel can index
# per-(head-group) blocks with no XLA transpose.
# ---------------------------------------------------------------------------
def _linear_grouped_kernel(x_ref, w_ref, b_ref, o_ref, acc_ref, *, gpt, gw):
    k = pl.program_id(2)

    @pl.when(k == 0)
    def _init():
        acc_ref[...] = jnp.zeros_like(acc_ref)

    # bf16 x bf16 -> f32 accumulate, MXU-natural (K on sublanes of the RHS).
    acc_ref[...] += jnp.dot(x_ref[...], w_ref[...],
                            preferred_element_type=jnp.float32)

    @pl.when(k == pl.num_programs(2) - 1)
    def _finalize():
        y = acc_ref[...] + b_ref[...].astype(jnp.float32)   # (tm, tn)
        for g in range(gpt):                                 # static unroll
            o_ref[g] = y[:, g * gw:(g + 1) * gw].astype(o_ref.dtype)


def linear_grouped_pallas(x, w_t, b, *, group_width, out_dtype=jnp.bfloat16,
                          tm_target=512, tn_target=1024, tk_target=1536):
    """x: (M, K); w_t: (K, N) [pre-transposed]; b: (N,).
    Returns y laid out as (N // group_width, M, group_width)."""
    M, K = x.shape
    N = w_t.shape[1]
    gw = group_width
    assert N % gw == 0
    tm = _pick_tile(M, 8, tm_target)
    tk = _pick_tile(K, 128, tk_target)
    tn = _pick_tile(N, gw, max(gw, (tn_target // gw) * gw))
    gpt = tn // gw
    b2 = b.reshape(1, N)

    block_bytes = (_nbytes((tm, tk), x.dtype) + _nbytes((tk, tn), w_t.dtype)
                   + _nbytes((1, tn), b2.dtype)
                   + _nbytes((gpt, tm, gw), out_dtype))
    scratch_bytes = _nbytes((tm, tn), jnp.float32)
    cost = pl.CostEstimate(
        flops=2 * M * N * K,
        transcendentals=0,
        bytes_accessed=int(_nbytes((M, K), x.dtype) + _nbytes((K, N), w_t.dtype)
                           + _nbytes((N,), b.dtype) + _nbytes((M, N), out_dtype)))

    return pl.pallas_call(
        functools.partial(_linear_grouped_kernel, gpt=gpt, gw=gw),
        out_shape=jax.ShapeDtypeStruct((N // gw, M, gw), out_dtype),
        grid=(M // tm, N // tn, K // tk),
        in_specs=[
            pl.BlockSpec((tm, tk), lambda i, j, k: (i, k)),
            pl.BlockSpec((tk, tn), lambda i, j, k: (k, j)),
            pl.BlockSpec((1, tn), lambda i, j, k: (0, j)),
        ],
        out_specs=pl.BlockSpec((gpt, tm, gw), lambda i, j, k: (j, i, 0)),
        scratch_shapes=[pltpu.VMEM((tm, tn), jnp.float32)],
        compiler_params=pltpu.CompilerParams(
            dimension_semantics=("parallel", "parallel", "arbitrary"),
            vmem_limit_bytes=_vmem_limit(block_bytes, scratch_bytes)),
        cost_estimate=cost,
    )(x, w_t, b2)


# ---------------------------------------------------------------------------
# Kernel 2: attention (softmax(q k^T + mask) v) for a group of hb heads with
# the output projection fused in.  Grid = (B, q-tiles, head-groups); the
# head-group axis is the innermost reduction, accumulating into a lane-dense
# (B, T_pad, E) output.
# ---------------------------------------------------------------------------
def _attention_kernel(*refs, has_mask, mask_per_head, out_weights, hb,
                      head_dim, s_actual, exact_recip):
    it = iter(refs)
    q_ref = next(it)                          # (1, 1, tq, hb*D)  (q pre-scaled)
    k_ref = next(it)                          # (1, 1, S_pad, hb*D)
    v_ref = next(it)                          # (1, 1, S_pad, hb*D)
    wo_ref = next(it)                         # (1, hb*D, E) out_proj group slice
    ob_ref = next(it)                         # (1, E)       out_proj bias
    m_ref = next(it) if has_mask else None    # (1, 1|hb, tq, S_pad) additive mask
    o_ref = next(it)                          # (1, tq, E) output (accumulated)
    w_ref = next(it) if out_weights else None  # (1, hb, tq, S_pad) attn weights
    acc_ref = next(it)                        # (tq, E) f32 scratch

    g = pl.program_id(2)
    tq = q_ref.shape[2]
    s_pad = k_ref.shape[2]

    # additive bias shared by every head of the group: broadcast user mask and
    # the in-kernel key-padding mask (no dense pad-mask DMA).
    base_bias = None
    if s_actual < s_pad:
        col = lax.broadcasted_iota(jnp.int32, (tq, s_pad), 1)
        base_bias = jnp.where(col < s_actual, 0.0, -1e30).astype(jnp.float32)
    if has_mask and not mask_per_head:
        um = m_ref[0, 0].astype(jnp.float32)
        base_bias = um if base_bias is None else um + base_bias

    head_outs = []
    for h in range(hb):                       # static unroll over the group
        lo = h * head_dim
        hi = lo + head_dim
        qh = q_ref[0, 0, :, lo:hi]            # (tq, D) bf16
        kh = k_ref[0, 0, :, lo:hi]            # (S_pad, D) bf16
        vh = v_ref[0, 0, :, lo:hi]            # (S_pad, D) bf16

        # scores = q @ k^T without materializing a transposed copy of k.
        scores = lax.dot_general(
            qh, kh, dimension_numbers=(((1,), (1,)), ((), ())),
            preferred_element_type=jnp.float32)            # (tq, S_pad) f32
        if has_mask and mask_per_head:
            scores = scores + m_ref[0, h].astype(jnp.float32)
        if base_bias is not None:
            scores = scores + base_bias

        scores = scores - jnp.max(scores, axis=-1, keepdims=True)
        # TODO(synk): optional bf16 exp on v6e/v7x if the EUP becomes binding.
        e = jnp.exp(scores)
        denom = jnp.sum(e, axis=-1, keepdims=True)
        if exact_recip:
            probs = e / denom
        else:
            probs = e * pl.reciprocal(denom, approx=True)

        if out_weights:
            w_ref[0, h] = probs.astype(w_ref.dtype)

        head_outs.append(jnp.dot(probs.astype(vh.dtype), vh,
                                 preferred_element_type=jnp.float32))  # (tq, D)

    # concat heads -> one (tq, hb*D) @ (hb*D, E) out_proj matmul (deep MXU).
    ho = head_outs[0] if hb == 1 else jnp.concatenate(head_outs, axis=-1)
    contrib = jnp.dot(ho.astype(wo_ref.dtype), wo_ref[0],
                      preferred_element_type=jnp.float32)              # (tq, E)

    @pl.when(g == 0)
    def _init():
        acc_ref[...] = jnp.broadcast_to(ob_ref[...].astype(jnp.float32),
                                        acc_ref.shape)

    acc_ref[...] += contrib

    @pl.when(g == pl.num_programs(2) - 1)
    def _finalize():
        o_ref[0] = acc_ref[...].astype(o_ref.dtype)


def attention_pallas(q_arr, k_arr, v_arr, q_off, k_off, v_off, o_wg, o_b2, *,
                     mask=None, mask_per_head=False, hb, head_dim, s_actual,
                     tq, output_attentions=False, out_dtype=jnp.float32,
                     weights_dtype=jnp.float32):
    """q_arr/k_arr/v_arr: (n_groups_total, B, T_or_S_pad, hb*D) slabs produced
    by linear_grouped_pallas; *_off select the q/k/v head-group ranges.
    o_wg: (G, hb*D, E) out_proj slices; o_b2: (1, E).  mask (optional):
    (B, 1|H, T_pad, S_pad) additive, bf16.  Returns ((B,T_pad,E), weights|None)."""
    G, gw, E = o_wg.shape
    B = q_arr.shape[1]
    T_pad = q_arr.shape[2]
    S_pad = k_arr.shape[2]
    H = G * hb
    has_mask = mask is not None

    def _q_map(off):
        return lambda b, qi, g: (off + g, b, qi, 0)

    def _kv_map(off):
        return lambda b, qi, g: (off + g, b, 0, 0)

    in_specs = [
        pl.BlockSpec((1, 1, tq, gw), _q_map(q_off)),
        pl.BlockSpec((1, 1, S_pad, gw), _kv_map(k_off)),
        pl.BlockSpec((1, 1, S_pad, gw), _kv_map(v_off)),
        pl.BlockSpec((1, gw, E), lambda b, qi, g: (g, 0, 0)),
        pl.BlockSpec((1, E), lambda b, qi, g: (0, 0)),
    ]
    operands = [q_arr, k_arr, v_arr, o_wg, o_b2]
    block_bytes = (_nbytes((tq, gw), q_arr.dtype)
                   + 2 * _nbytes((S_pad, gw), k_arr.dtype)
                   + _nbytes((gw, E), o_wg.dtype)
                   + _nbytes((1, E), o_b2.dtype)
                   + _nbytes((tq, E), out_dtype))
    if has_mask:
        mh = hb if mask_per_head else 1
        if mask_per_head:
            in_specs.append(pl.BlockSpec((1, mh, tq, S_pad),
                                         lambda b, qi, g: (b, g, qi, 0)))
        else:
            in_specs.append(pl.BlockSpec((1, mh, tq, S_pad),
                                         lambda b, qi, g: (b, 0, qi, 0)))
        operands.append(mask)
        block_bytes += _nbytes((mh, tq, S_pad), mask.dtype)

    out_shape = [jax.ShapeDtypeStruct((B, T_pad, E), out_dtype)]
    out_specs = [pl.BlockSpec((1, tq, E), lambda b, qi, g: (b, qi, 0))]
    if output_attentions:
        out_shape.append(jax.ShapeDtypeStruct((B, H, T_pad, S_pad), weights_dtype))
        out_specs.append(pl.BlockSpec((1, hb, tq, S_pad),
                                      lambda b, qi, g: (b, g, qi, 0)))
        block_bytes += _nbytes((hb, tq, S_pad), weights_dtype)

    # accumulator + live softmax / per-head intermediates (not double-buffered)
    scratch_bytes = (_nbytes((tq, E), jnp.float32)
                     + 3 * tq * S_pad * 4
                     + (hb + 1) * tq * head_dim * 4
                     + tq * gw * 4)

    bytes_accessed = (_nbytes((G, B, T_pad, gw), q_arr.dtype)
                      + 2 * _nbytes((G, B, S_pad, gw), k_arr.dtype)
                      + _nbytes(o_wg.shape, o_wg.dtype)
                      + _nbytes((B, T_pad, E), out_dtype))
    if has_mask:
        bytes_accessed += _nbytes(mask.shape, mask.dtype)
    if output_attentions:
        bytes_accessed += _nbytes((B, H, T_pad, S_pad), weights_dtype)
    cost = pl.CostEstimate(
        flops=int(4 * B * H * T_pad * S_pad * head_dim + 2 * B * T_pad * E * E),
        transcendentals=int(B * H * T_pad * S_pad),
        bytes_accessed=int(bytes_accessed))

    outs = pl.pallas_call(
        functools.partial(_attention_kernel, has_mask=has_mask,
                          mask_per_head=mask_per_head,
                          out_weights=output_attentions, hb=hb,
                          head_dim=head_dim, s_actual=s_actual,
                          exact_recip=output_attentions),
        out_shape=tuple(out_shape),
        grid=(B, T_pad // tq, G),
        in_specs=in_specs,
        out_specs=tuple(out_specs),
        scratch_shapes=[pltpu.VMEM((tq, E), jnp.float32)],
        compiler_params=pltpu.CompilerParams(
            dimension_semantics=("parallel", "parallel", "arbitrary"),
            vmem_limit_bytes=_vmem_limit(block_bytes, scratch_bytes)),
        cost_estimate=cost,
    )(*operands)

    if output_attentions:
        return outs[0], outs[1]
    return outs[0], None


# ---------------------------------------------------------------------------
# Parameters (nn.Linear-style) + one-time fused/pre-arranged bf16 forms
# ---------------------------------------------------------------------------
def init_whisper_attention_params(key, embed_dim):
    keys = jax.random.split(key, 7)
    s = 1.0 / math.sqrt(embed_dim)
    u = lambda kk, shape: jax.random.uniform(kk, shape, jnp.float32, -s, s)
    return {
        "q_w": u(keys[0], (embed_dim, embed_dim)),
        "q_b": u(keys[1], (embed_dim,)),
        "k_w": u(keys[2], (embed_dim, embed_dim)),   # k_proj: bias=False
        "v_w": u(keys[3], (embed_dim, embed_dim)),
        "v_b": u(keys[4], (embed_dim,)),
        "o_w": u(keys[5], (embed_dim, embed_dim)),
        "o_b": u(keys[6], (embed_dim,)),
    }


def prepare_whisper_attention_params(params, num_heads,
                                     compute_dtype=jnp.bfloat16):
    """One-time (checkpoint-load-time) weight rearrangement:
       - q scaling folded into q weights/bias
       - q/k/v weights concatenated (fused projection) and PRE-TRANSPOSED to
         (K, N) so the linear kernel uses the MXU-natural contraction
       - out_proj weight split per head-group as (G, hb*D, E) so the output
         projection is fused into the attention kernel
       - everything matmul-side cast to bf16 once; biases stay f32."""
    E = params["q_w"].shape[0]
    H = num_heads
    assert E % H == 0
    D = E // H
    hb = _pick_head_block(H, D)
    G = H // hb
    scaling = D ** -0.5
    zeros_b = jnp.zeros((E,), params["q_b"].dtype)
    q_w = params["q_w"] * scaling
    q_b = params["q_b"] * scaling
    cd = compute_dtype
    return {
        "num_heads": H, "head_dim": D, "hb": hb, "compute_dtype": cd,
        "qkv_wt": jnp.concatenate([q_w, params["k_w"], params["v_w"]],
                                  axis=0).T.astype(cd),            # (E, 3E)
        "qkv_b": jnp.concatenate([q_b, zeros_b, params["v_b"]],
                                 axis=0).astype(jnp.float32),
        "q_wt": q_w.T.astype(cd),                                   # (E, E)
        "q_b": q_b.astype(jnp.float32),
        "kv_wt": jnp.concatenate([params["k_w"], params["v_w"]],
                                 axis=0).T.astype(cd),              # (E, 2E)
        "kv_b": jnp.concatenate([zeros_b, params["v_b"]],
                                axis=0).astype(jnp.float32),
        "o_wg": params["o_w"].T.reshape(G, hb * D, E).astype(cd),   # (G, hb*D, E)
        "o_b": params["o_b"].reshape(1, E).astype(jnp.float32),
    }


# ---------------------------------------------------------------------------
# Forward wrapper
# ---------------------------------------------------------------------------
def _pad_seq(x, target_len):
    if x.shape[1] == target_len:
        return x
    return jnp.pad(x, ((0, 0), (0, target_len - x.shape[1]), (0, 0)))


def whisper_attention_forward(prepared, hidden_states, key_value_states=None,
                              attention_mask=None, output_attentions=True):
    H = prepared["num_heads"]
    D = prepared["head_dim"]
    hb = prepared["hb"]
    G = H // hb
    gw = hb * D
    cd = prepared["compute_dtype"]
    B, T, E = hidden_states.shape
    out_dtype = hidden_states.dtype

    # pad the query axis to a bounded tile (keeps VMEM small + pipelined).
    tq = min(256, _round_up(T, 8))
    T_pad = _round_up(T, tq)
    x = _pad_seq(hidden_states, T_pad).astype(cd)

    if key_value_states is None:
        # self-attention: single fused Q/K/V projection, output already in
        # (3G, B*T_pad, hb*D) grouped layout -> no head-split transpose.
        S, S_pad = T, T_pad
        qkv = linear_grouped_pallas(x.reshape(B * T_pad, E), prepared["qkv_wt"],
                                    prepared["qkv_b"], group_width=gw,
                                    out_dtype=cd)
        qkv = qkv.reshape(3 * G, B, T_pad, gw)          # free reshape
        q_arr = k_arr = v_arr = qkv
        q_off, k_off, v_off = 0, G, 2 * G
    else:
        # cross-attention: Q from hidden_states, fused K/V from key_value_states
        S = key_value_states.shape[1]
        S_pad = _round_up(S, 128) if S > 128 else _round_up(S, 8)
        kvx = _pad_seq(key_value_states, S_pad).astype(cd)
        q_arr = linear_grouped_pallas(x.reshape(B * T_pad, E), prepared["q_wt"],
                                      prepared["q_b"], group_width=gw,
                                      out_dtype=cd).reshape(G, B, T_pad, gw)
        kv = linear_grouped_pallas(kvx.reshape(B * S_pad, E), prepared["kv_wt"],
                                   prepared["kv_b"], group_width=gw,
                                   out_dtype=cd).reshape(2 * G, B, S_pad, gw)
        k_arr = v_arr = kv
        q_off, k_off, v_off = 0, 0, G

    mask = None
    mask_per_head = False
    if attention_mask is not None:
        m = attention_mask[:, :, :, :S]
        if m.shape[1] not in (1, H):
            raise ValueError("attention_mask head dim must be 1 or num_heads")
        mask_per_head = (m.shape[1] == H)
        m = jnp.pad(m, ((0, 0), (0, 0), (0, T_pad - T), (0, S_pad - S)))
        mask = m.astype(jnp.bfloat16)

    attn_out, attn_weights = attention_pallas(
        q_arr, k_arr, v_arr, q_off, k_off, v_off,
        prepared["o_wg"], prepared["o_b"],
        mask=mask, mask_per_head=mask_per_head,
        hb=hb, head_dim=D, s_actual=S, tq=tq,
        output_attentions=output_attentions, out_dtype=out_dtype)

    attn_out = attn_out[:, :T, :]
    if attn_weights is not None:
        attn_weights = attn_weights[:, :, :T, :S]

    # TODO(synk): KV cache (past_key_value), layer_head_mask and dropout are
    # not implemented (eval / no-cache path of the reference module).
    return attn_out, attn_weights, None


# ---------------------------------------------------------------------------
# Pure-JAX reference (f32) for correctness checks
# ---------------------------------------------------------------------------
def _reference(params, x, num_heads, key_value_states=None, attention_mask=None):
    B, T, E = x.shape
    H = num_heads
    D = E // H
    scaling = D ** -0.5
    kv_src = x if key_value_states is None else key_value_states
    S = kv_src.shape[1]
    q = (x @ params["q_w"].T + params["q_b"]) * scaling
    k = kv_src @ params["k_w"].T
    v = kv_src @ params["v_w"].T + params["v_b"]
    q = q.reshape(B, T, H, D).transpose(0, 2, 1, 3)
    k = k.reshape(B, S, H, D).transpose(0, 2, 1, 3)
    v = v.reshape(B, S, H, D).transpose(0, 2, 1, 3)
    s = jnp.einsum("bhtd,bhsd->bhts", q, k)
    if attention_mask is not None:
        s = s + attention_mask[:, :, :, :S]
    p = jax.nn.softmax(s, axis=-1)
    o = jnp.einsum("bhts,bhsd->bhtd", p, v)
    o = o.transpose(0, 2, 1, 3).reshape(B, T, E)
    return o @ params["o_w"].T + params["o_b"], p


if __name__ == "__main__":
    key = jax.random.PRNGKey(0)
    k_param, k_x, k_kv = jax.random.split(key, 3)

    embed_dim = 256
    num_heads = 4          # head_dim = 64 -> head group of 4 (256-deep MXU)
    batch = 2
    seq = 12               # not a multiple of 8 -> exercises query/key padding
    seq_kv = 20            # exercises cross-attention key padding

    params = init_whisper_attention_params(k_param, embed_dim)
    prepared = prepare_whisper_attention_params(params, num_heads)
    hidden_states = jax.random.normal(k_x, (batch, seq, embed_dim), jnp.float32)
    kv_states = jax.random.normal(k_kv, (batch, seq_kv, embed_dim), jnp.float32)

    # additive causal-style attention mask (B, 1, T, S)
    mask_bias = jnp.where(
        jnp.arange(seq)[None, :] <= jnp.arange(seq)[:, None], 0.0, -1e9
    ).astype(jnp.float32)
    attention_mask = jnp.broadcast_to(mask_bias, (batch, 1, seq, seq))

    # 1) self-attention with mask + attention weights
    out1, w1, _ = whisper_attention_forward(
        prepared, hidden_states, attention_mask=attention_mask,
        output_attentions=True)
    out1 = jax.block_until_ready(out1)
    w1 = jax.block_until_ready(w1)
    ref_out1, ref_w1 = _reference(params, hidden_states, num_heads,
                                  attention_mask=attention_mask)
    assert out1.shape == (batch, seq, embed_dim)
    assert w1.shape == (batch, num_heads, seq, seq)
    assert jnp.allclose(out1, ref_out1, atol=2e-2, rtol=2e-2)
    assert jnp.allclose(w1, ref_w1, atol=2e-2, rtol=2e-2)

    # 2) self-attention, no mask, no weights (fast path, approx reciprocal)
    out2, w2, _ = whisper_attention_forward(
        prepared, hidden_states, output_attentions=False)
    out2 = jax.block_until_ready(out2)
    ref_out2, _ = _reference(params, hidden_states, num_heads)
    assert w2 is None
    assert jnp.allclose(out2, ref_out2, atol=2e-2, rtol=2e-2)

    # 3) cross-attention (key_value_states), no mask, with weights
    out3, w3, _ = whisper_attention_forward(
        prepared, hidden_states, key_value_states=kv_states,
        output_attentions=True)
    out3 = jax.block_until_ready(out3)
    w3 = jax.block_until_ready(w3)
    ref_out3, ref_w3 = _reference(params, hidden_states, num_heads,
                                  key_value_states=kv_states)
    assert out3.shape == (batch, seq, embed_dim)
    assert w3.shape == (batch, num_heads, seq, seq_kv)
    assert jnp.allclose(out3, ref_out3, atol=2e-2, rtol=2e-2)
    assert jnp.allclose(w3, ref_w3, atol=2e-2, rtol=2e-2)

    print("KERNEL_OK")
</pallas_src>

<mosaic_0001>
module attributes {stable_mosaic.version = 11 : i64} {
  func.func @_linear_grouped_kernel(%arg0: i32, %arg1: i32, %arg2: i32, %arg3: memref<32x256xbf16, #tpu.memory_space<vmem>>, %arg4: memref<256x768xbf16, #tpu.memory_space<vmem>>, %arg5: memref<1x768xf32, #tpu.memory_space<vmem>>, %arg6: memref<3x32x256xbf16, #tpu.memory_space<vmem>>, %arg7: memref<32x768xf32, #tpu.memory_space<vmem>>) attributes {dimension_semantics = [#tpu.dimension_semantics<parallel>, #tpu.dimension_semantics<parallel>, #tpu.dimension_semantics<arbitrary>], iteration_bounds = array<i64: 1, 1, 1>, scalar_prefetch = 0 : i64, scratch_operands = 1 : i64, tpu.core_type = #tpu.core_type<tc>, window_params = [{transform_indices = @transform_0, window_bounds = array<i64: 32, 256>}, {transform_indices = @transform_1, window_bounds = array<i64: 256, 768>}, {transform_indices = @transform_2, window_bounds = array<i64: 1, 768>}, {transform_indices = @transform_3, window_bounds = array<i64: 3, 32, 256>}]} {
    %c0_i32 = arith.constant 0 : i32
    %0 = arith.cmpi eq, %arg2, %c0_i32 : i32
    %1 = arith.extui %0 : i1 to i32
    %c0_i32_0 = arith.constant 0 : i32
    %2 = arith.cmpi ne, %1, %c0_i32_0 : i32
    scf.if %2 {
      %cst_10 = arith.constant 0.000000e+00 : f32
      %12 = vector.broadcast %cst_10 : f32 to vector<32x768xf32>
      %c0_11 = arith.constant 0 : index
      %c0_12 = arith.constant 0 : index
      %13 = vector.load %arg7[%c0_11, %c0_12] : memref<32x768xf32, #tpu.memory_space<vmem>>, vector<32x768xf32>
      tpu.vector_store %arg7[%c0_11, %c0_12], %12 {strides = array<i32>} : memref<32x768xf32, #tpu.memory_space<vmem>>, vector<32x768xf32>,
    } else {
    }
    %c0 = arith.constant 0 : index
    %c0_1 = arith.constant 0 : index
    %3 = vector.load %arg7[%c0, %c0_1] : memref<32x768xf32, #tpu.memory_space<vmem>>, vector<32x768xf32>
    %c0_2 = arith.constant 0 : index
    %c0_3 = arith.constant 0 : index
    %4 = vector.load %arg3[%c0_2, %c0_3] : memref<32x256xbf16, #tpu.memory_space<vmem>>, vector<32x256xbf16>
    %c0_4 = arith.constant 0 : index
    %c0_5 = arith.constant 0 : index
    %5 = vector.load %arg4[%c0_4, %c0_5] : memref<256x768xbf16, #tpu.memory_space<vmem>>, vector<256x768xbf16>
    %cst = arith.constant dense<0.000000e+00> : vector<32x768xf32>
    %6 = tpu.matmul %4, %5, %cst {dimension_numbers = #tpu.dot_dimension_numbers<[1], [0], [0], [1], [0, 0, 1, 1], [], []>} : vector<32x256xbf16>, vector<256x768xbf16>, vector<32x768xf32> -> vector<32x768xf32>
    %7 = arith.addf %3, %6 : vector<32x768xf32>
    %c0_6 = arith.constant 0 : index
    %c0_7 = arith.constant 0 : index
    %8 = vector.load %arg7[%c0_6, %c0_7] : memref<32x768xf32, #tpu.memory_space<vmem>>, vector<32x768xf32>
    tpu.vector_store %arg7[%c0_6, %c0_7], %7 {strides = array<i32>} : memref<32x768xf32, #tpu.memory_space<vmem>>, vector<32x768xf32>,
    %c0_i32_8 = arith.constant 0 : i32
    %9 = arith.cmpi eq, %arg2, %c0_i32_8 : i32
    %10 = arith.extui %9 : i1 to i32
    %c0_i32_9 = arith.constant 0 : i32
    %11 = arith.cmpi ne, %10, %c0_i32_9 : i32
    scf.if %11 {
      %c0_10 = arith.constant 0 : index
      %c0_11 = arith.constant 0 : index
      %12 = vector.load %arg7[%c0_10, %c0_11] : memref<32x768xf32, #tpu.memory_space<vmem>>, vector<32x768xf32>
      %c0_12 = arith.constant 0 : index
      %c0_13 = arith.constant 0 : index
      %13 = vector.load %arg5[%c0_12, %c0_13] : memref<1x768xf32, #tpu.memory_space<vmem>>, vector<1x768xf32>
      %14 = vector.broadcast %13 : vector<1x768xf32> to vector<32x768xf32>
      %15 = arith.addf %12, %14 : vector<32x768xf32>
      %16 = vector.extract_strided_slice %15 {offsets = [0, 0], sizes = [32, 256], strides = [1, 1]} : vector<32x768xf32> to vector<32x256xf32>
      %17 = arith.truncf %16 : vector<32x256xf32> to vector<32x256xbf16>
      %c0_14 = arith.constant 0 : index
      %c0_15 = arith.constant 0 : index
      %c0_16 = arith.constant 0 : index
      %18 = vector.load %arg6[%c0_14, %c0_15, %c0_16] : memref<3x32x256xbf16, #tpu.memory_space<vmem>>, vector<1x32x256xbf16>
      %19 = vector.shape_cast %18 : vector<1x32x256xbf16> to vector<32x256xbf16>
      %20 = vector.shape_cast %17 : vector<32x256xbf16> to vector<1x32x256xbf16>
      tpu.vector_store %arg6[%c0_14, %c0_15, %c0_16], %20 {strides = array<i32>} : memref<3x32x256xbf16, #tpu.memory_space<vmem>>, vector<1x32x256xbf16>,
      %21 = vector.extract_strided_slice %15 {offsets = [0, 256], sizes = [32, 256], strides = [1, 1]} : vector<32x768xf32> to vector<32x256xf32>
      %22 = arith.truncf %21 : vector<32x256xf32> to vector<32x256xbf16>
      %c1 = arith.constant 1 : index
      %c0_17 = arith.constant 0 : index
      %c0_18 = arith.constant 0 : index
      %23 = vector.load %arg6[%c1, %c0_17, %c0_18] : memref<3x32x256xbf16, #tpu.memory_space<vmem>>, vector<1x32x256xbf16>
      %24 = vector.shape_cast %23 : vector<1x32x256xbf16> to vector<32x256xbf16>
      %25 = vector.shape_cast %22 : vector<32x256xbf16> to vector<1x32x256xbf16>
      tpu.vector_store %arg6[%c1, %c0_17, %c0_18], %25 {strides = array<i32>} : memref<3x32x256xbf16, #tpu.memory_space<vmem>>, vector<1x32x256xbf16>,
      %26 = vector.extract_strided_slice %15 {offsets = [0, 512], sizes = [32, 256], strides = [1, 1]} : vector<32x768xf32> to vector<32x256xf32>
      %27 = arith.truncf %26 : vector<32x256xf32> to vector<32x256xbf16>
      %c2 = arith.constant 2 : index
      %c0_19 = arith.constant 0 : index
      %c0_20 = arith.constant 0 : index
      %28 = vector.load %arg6[%c2, %c0_19, %c0_20] : memref<3x32x256xbf16, #tpu.memory_space<vmem>>, vector<1x32x256xbf16>
      %29 = vector.shape_cast %28 : vector<1x32x256xbf16> to vector<32x256xbf16>
      %30 = vector.shape_cast %27 : vector<32x256xbf16> to vector<1x32x256xbf16>
      tpu.vector_store %arg6[%c2, %c0_19, %c0_20], %30 {strides = array<i32>} : memref<3x32x256xbf16, #tpu.memory_space<vmem>>, vector<1x32x256xbf16>,
    } else {
    }
    return
  }
  func.func @transform_0(%arg0: i32, %arg1: i32, %arg2: i32) -> (i32, i32) {
    %c0_i32 = arith.constant 0 : i32
    return %arg0, %arg2 : i32, i32
  }
  func.func @transform_1(%arg0: i32, %arg1: i32, %arg2: i32) -> (i32, i32) {
    %c0_i32 = arith.constant 0 : i32
    return %arg2, %arg1 : i32, i32
  }
  func.func @transform_2(%arg0: i32, %arg1: i32, %arg2: i32) -> (i32, i32) {
    %c0_i32 = arith.constant 0 : i32
    %c0_i32_0 = arith.constant 0 : i32
    return %c0_i32, %arg1 : i32, i32
  }
  func.func @transform_3(%arg0: i32, %arg1: i32, %arg2: i32) -> (i32, i32, i32) {
    %c0_i32 = arith.constant 0 : i32
    %c0_i32_0 = arith.constant 0 : i32
    return %arg1, %arg0, %c0_i32 : i32, i32, i32
  }
}

</mosaic_0001>

<bundles_post_ra>
// kernel: tpu_custom_call.1
= control target key start
LH: loop header
LB: loop body
LE: loop exit
PB: predicated region body
PF: predicated region fallthrough
CT: control target
= control target key end

     0   :  { %8 = vsyncpa [#allocation4], 0  ;;  %s1573_s0 = inlined_call_operand.hbm [shape: bf16[32,256], index: 0, kind: input, shape index: {}]   ;;  %s1574_s1 = inlined_call_operand.hbm [shape: bf16[256,768], index: 1, kind: input, shape index: {}]   ;;  %s1575_s2 = inlined_call_operand.hbm [shape: f32[1,768], index: 2, kind: input, shape index: {}]   ;;  %s1576_s3 = inlined_call_operand.hbm [shape: bf16[3,32,256], index: 3, kind: output, shape index: {}]  }
   0x1   :  { %9 = vsyncpa [#allocation7], 0 }
   0x2   :  { %10 = vsyncpa [#allocation5], 0  ;;  %s1500_s12 = smov [#allocation6]  }
   0x3   :  { %s28_s13 = sshll.u32 %s1500_s12, 4  ;;  %s29_s13 = int_to_ptr.vmem [resolvable:$true] %s28_s13 }
   0x4   :  { %s1422_s14 = scalar_lea.vmem %s29_s13, 12288  ;;  %p1427_p1 = scmp.lt.s32.totalorder %s29_s13, %s29_s13 }
   0x5   :  { %p1423_p0 = scmp.ne.s32.totalorder %s29_s13, %s1422_s14  ;;  %p1428_p2 = scmp.lt.s32.totalorder %s1422_s14, %s1422_s14 }
   0x7   :  { %p1429_p3 = por %p1428_p2, %p1427_p1 }
   0x9   :  { %p1430_p4 = pnand %p1429_p3, %p1423_p0 }
   0xb   :  { %1433 = shalt.err (!%p1430_p4)
}
   0xc   :  { %s1501_s15 = smov 384   ;;  %s1502_s16 = smov 24  }
   0xd   :  { %34 = dma.hbm_to_vmem [thread:$0]  %s1574_s1, 12288, %s29_s13, [#allocation7], %s1501_s15, %s1501_s15, %s1502_s16  }
   0xe   :  { %s1503_s19 = smov [#allocation3]  }
   0xf   :  { %s16_s20 = sshll.u32 %s1503_s19, 4  ;;  %s17_s20 = int_to_ptr.vmem [resolvable:$true] %s16_s20 }
  0x10   :  { %s1442_s21 = scalar_lea.vmem %s17_s20, 512  ;;  %p1447_p6 = scmp.lt.s32.totalorder %s17_s20, %s17_s20 }
  0x11   :  { %p1443_p5 = scmp.ne.s32.totalorder %s17_s20, %s1442_s21  ;;  %p1448_p7 = scmp.lt.s32.totalorder %s1442_s21, %s1442_s21 }
  0x13   :  { %p1449_p8 = por %p1448_p7, %p1447_p6 }
  0x15   :  { %p1450_p9 = pnand %p1449_p8, %p1443_p5 }
  0x17   :  { %1453 = shalt.err (!%p1450_p9)
}
  0x18   :  { %s1504_s22 = smov 128   ;;  %s1505_s23 = smov 8  }
  0x19   :  { %22 = dma.hbm_to_vmem [thread:$0]  %s1573_s0, 512, %s17_s20, [#allocation4], %s1504_s22, %s1504_s22, %s1505_s23  }
  0x1a   :  { %s1506_s1 = smov [#allocation8]  }
  0x1b   :  { %s41_s26 = sshll.u32 %s1506_s1, 4  ;;  %s42_s26 = int_to_ptr.vmem [resolvable:$true] %s41_s26 }
  0x1c   :  { %s1462_s27 = scalar_lea.vmem %s42_s26, 96  ;;  %p1467_p11 = scmp.lt.s32.totalorder %s42_s26, %s42_s26 }
  0x1d   :  { %p1463_p10 = scmp.ne.s32.totalorder %s42_s26, %s1462_s27  ;;  %p1468_p12 = scmp.lt.s32.totalorder %s1462_s27, %s1462_s27 }
  0x1f   :  { %p1469_p13 = por %p1468_p12, %p1467_p11 }
  0x21   :  { %p1470_p0 = pnand %p1469_p13, %p1463_p10 }
  0x23   :  { %1473 = shalt.err (!%p1470_p0)
}
  0x24   :  { %44 = dma.hbm_to_vmem [thread:$0]  %s1575_s2, 96, %s42_s26, [#allocation7]  }
  0x25   :  { %1494 = dma.done.wait [#allocation4], 512  }
  0x26   :  { %1495 = vsyncadd [#allocation4], 4294966784 }
  0x27   :  { %1496 = dma.done.wait [#allocation7], 12384  }
  0x28   :  { %1497 = vsyncadd [#allocation7], 4294954912  ;;  %v1264_v0 = vld [vmem:[#allocation6 + $0x154] ss:$24 sps:$4 sm:$0xff]   ;;  %v1268_v2 = vld [vmem:[#allocation6 + $0x150] ss:$24 sps:$4 sm:$0xff]  }
  0x29   :  { %v1266_v1 = vld [vmem:[#allocation6 + $0x15c] ss:$24 sps:$4 sm:$0xff]   ;;  %706 = vmatprep.subr.bf16.mxu0 %v1264_v0  ;;  %v1269_v3 = vld [vmem:[#allocation6 + $0x158] ss:$24 sps:$4 sm:$0xff]   ;;  %v1272_v5 = vld [vmem:[#allocation6 + $0x12c] ss:$24 sps:$4 sm:$0xff]  }
  0x2a   :  { %759 = vmatprep.subr.bf16.mxu1 %v1266_v1  ;;  %v1270_v4 = vld [vmem:[#allocation6 + $0x124] ss:$24 sps:$4 sm:$0xff]   ;;  %707 = vmatpush1.bf16.msra.mxu0 %v1268_v2  ;;  %v1274_v6 = vld [vmem:[#allocation6 + $0x120] ss:$24 sps:$4 sm:$0xff]   ;;  %v1276_v8 = vld [vmem:[#allocation6 + $0xf4] ss:$24 sps:$4 sm:$0xff]  }
  0x2b   :  { %760 = vmatpush1.bf16.msra.mxu1 %v1269_v3  ;;  %708 = vmatprep.subr.bf16.mxu0 %v1270_v4  ;;  %v1275_v7 = vld [vmem:[#allocation6 + $0x128] ss:$24 sps:$4 sm:$0xff]   ;;  %v1278_v9 = vld [vmem:[#allocation6 + $0xfc] ss:$24 sps:$4 sm:$0xff]   ;;  %v1281_v11 = vld [vmem:[#allocation6 + $0xf8] ss:$24 sps:$4 sm:$0xff]  }
  0x2c   :  { %761 = vmatprep.subr.bf16.mxu1 %v1272_v5  ;;  %v1280_v10 = vld [vmem:[#allocation6 + $0xf0] ss:$24 sps:$4 sm:$0xff]   ;;  %v1282_v12 = vld [vmem:[#allocation6 + $0xc4] ss:$24 sps:$4 sm:$0xff]   ;;  %v1286_v14 = vld [vmem:[#allocation6 + $0xc0] ss:$24 sps:$4 sm:$0xff]  }
  0x2d   :  { %v1284_v13 = vld [vmem:[#allocation6 + $0xcc] ss:$24 sps:$4 sm:$0xff]   ;;  %v1287_v15 = vld [vmem:[#allocation6 + $0xc8] ss:$24 sps:$4 sm:$0xff]   ;;  %v1290_v17 = vld [vmem:[#allocation6 + $0x9c] ss:$24 sps:$4 sm:$0xff]  }
  0x2e   :  { %709 = vmatpush1.bf16.msra.mxu0 %v1274_v6  ;;  %v1288_v16 = vld [vmem:[#allocation6 + $0x94] ss:$24 sps:$4 sm:$0xff]   ;;  %v1292_v18 = vld [vmem:[#allocation6 + $0x90] ss:$24 sps:$4 sm:$0xff]   ;;  %v1294_v20 = vld [vmem:[#allocation6 + $0x64] ss:$24 sps:$4 sm:$0xff]  }
  0x2f   :  { %762 = vmatpush1.bf16.msra.mxu1 %v1275_v7  ;;  %710 = vmatprep.subr.bf16.mxu0 %v1276_v8  ;;  %v1293_v19 = vld [vmem:[#allocation6 + $0x98] ss:$24 sps:$4 sm:$0xff]   ;;  %v1296_v21 = vld [vmem:[#allocation6 + $0x6c] ss:$24 sps:$4 sm:$0xff]   ;;  %v1299_v23 = vld [vmem:[#allocation6 + $0x68] ss:$24 sps:$4 sm:$0xff]  }
  0x30   :  { %763 = vmatprep.subr.bf16.mxu1 %v1278_v9  ;;  %v1298_v22 = vld [vmem:[#allocation6 + $0x60] ss:$24 sps:$4 sm:$0xff]   ;;  %v1300_v24 = vld [vmem:[#allocation6 + $0x34] ss:$24 sps:$4 sm:$0xff]   ;;  %v1304_v26 = vld [vmem:[#allocation6 + $0x30] ss:$24 sps:$4 sm:$0xff]  }
  0x31   :  { %v1302_v25 = vld [vmem:[#allocation6 + $0x3c] ss:$24 sps:$4 sm:$0xff]   ;;  %v1305_v27 = vld [vmem:[#allocation6 + $0x38] ss:$24 sps:$4 sm:$0xff]   ;;  %v1308_v29 = vld [vmem:[#allocation6 + $0xc] ss:$24 sps:$4 sm:$0xff]  }
  0x32   :  { %711 = vmatpush1.bf16.msra.mxu0 %v1280_v10  ;;  %v1306_v28 = vld [vmem:[#allocation6 + $0x4] ss:$24 sps:$4 sm:$0xff]   ;;  %v1310_v30 = vld [vmem:[#allocation6] ss:$24 sps:$4 sm:$0xff]   ;;  %v1312_v32 = vld [vmem:[#allocation6 + $0x2d4] ss:$24 sps:$4 sm:$0xff]  }
  0x33   :  { %764 = vmatpush1.bf16.msra.mxu1 %v1281_v11  ;;  %712 = vmatprep.subr.bf16.mxu0 %v1282_v12  ;;  %v1311_v31 = vld [vmem:[#allocation6 + $0x8] ss:$24 sps:$4 sm:$0xff]   ;;  %v1314_v33 = vld [vmem:[#allocation6 + $0x2dc] ss:$24 sps:$4 sm:$0xff]   ;;  %v1317_v35 = vld [vmem:[#allocation6 + $0x2d8] ss:$24 sps:$4 sm:$0xff]  }
  0x34   :  { %765 = vmatprep.subr.bf16.mxu1 %v1284_v13  ;;  %v1316_v34 = vld [vmem:[#allocation6 + $0x2d0] ss:$24 sps:$4 sm:$0xff]   ;;  %v1318_v36 = vld [vmem:[#allocation6 + $0x2a4] ss:$24 sps:$4 sm:$0xff]   ;;  %v1322_v38 = vld [vmem:[#allocation6 + $0x2a0] ss:$24 sps:$4 sm:$0xff]  }
  0x35   :  { %v1320_v37 = vld [vmem:[#allocation6 + $0x2ac] ss:$24 sps:$4 sm:$0xff]   ;;  %v1323_v39 = vld [vmem:[#allocation6 + $0x2a8] ss:$24 sps:$4 sm:$0xff]   ;;  %v1326_v41 = vld [vmem:[#allocation6 + $0x27c] ss:$24 sps:$4 sm:$0xff]  }
  0x36   :  { %713 = vmatpush1.bf16.msra.mxu0 %v1286_v14  ;;  %v1324_v40 = vld [vmem:[#allocation6 + $0x274] ss:$24 sps:$4 sm:$0xff]   ;;  %v1328_v42 = vld [vmem:[#allocation6 + $0x270] ss:$24 sps:$4 sm:$0xff]   ;;  %v1330_v44 = vld [vmem:[#allocation6 + $0x244] ss:$24 sps:$4 sm:$0xff]  }
  0x37   :  { %766 = vmatpush1.bf16.msra.mxu1 %v1287_v15  ;;  %714 = vmatprep.subr.bf16.mxu0 %v1288_v16  ;;  %v1329_v43 = vld [vmem:[#allocation6 + $0x278] ss:$24 sps:$4 sm:$0xff]   ;;  %v1332_v45 = vld [vmem:[#allocation6 + $0x24c] ss:$24 sps:$4 sm:$0xff]   ;;  %v1335_v47 = vld [vmem:[#allocation6 + $0x248] ss:$24 sps:$4 sm:$0xff]  }
  0x38   :  { %767 = vmatprep.subr.bf16.mxu1 %v1290_v17  ;;  %v1334_v46 = vld [vmem:[#allocation6 + $0x240] ss:$24 sps:$4 sm:$0xff]   ;;  %v1540_v48 = vld [vmem:[#allocation3 + $0x4] ss:$8 sps:$4 sm:$0xff]   ;;  %v1338_v50 = vld [vmem:[#allocation6 + $0x21c] ss:$24 sps:$4 sm:$0xff]  }
  0x39   :  { %v1336_v49 = vld [vmem:[#allocation6 + $0x214] ss:$24 sps:$4 sm:$0xff]   ;;  %738 = vmatprep.mubr.bf16.mxu0 %v1540_v48  ;;  %791 = vmatprep.mubr.bf16.mxu1 %v1540_v48  ;;  %v1340_v51 = vld [vmem:[#allocation6 + $0x210] ss:$24 sps:$4 sm:$0xff]   ;;  %v1342_v53 = vld [vmem:[#allocation6 + $0x1e4] ss:$24 sps:$4 sm:$0xff]  }
  0x3a   :  { %715 = vmatpush1.bf16.msra.mxu0 %v1292_v18  ;;  %v1341_v52 = vld [vmem:[#allocation6 + $0x218] ss:$24 sps:$4 sm:$0xff]   ;;  %v1344_v54 = vld [vmem:[#allocation6 + $0x1ec] ss:$24 sps:$4 sm:$0xff]   ;;  %v1347_v56 = vld [vmem:[#allocation6 + $0x1e8] ss:$24 sps:$4 sm:$0xff]  }
  0x3b   :  { %768 = vmatpush1.bf16.msra.mxu1 %v1293_v19  ;;  %716 = vmatprep.subr.bf16.mxu0 %v1294_v20  ;;  %v1346_v55 = vld [vmem:[#allocation6 + $0x1e0] ss:$24 sps:$4 sm:$0xff]   ;;  %v1348_v57 = vld [vmem:[#allocation6 + $0x1b4] ss:$24 sps:$4 sm:$0xff]   ;;  %v1352_v59 = vld [vmem:[#allocation6 + $0x1b0] ss:$24 sps:$4 sm:$0xff]  }
  0x3c   :  { %769 = vmatprep.subr.bf16.mxu1 %v1296_v21  ;;  %v1350_v58 = vld [vmem:[#allocation6 + $0x1bc] ss:$24 sps:$4 sm:$0xff]   ;;  %v1353_v60 = vld [vmem:[#allocation6 + $0x1b8] ss:$24 sps:$4 sm:$0xff]   ;;  %v1356_v62 = vld [vmem:[#allocation6 + $0x18c] ss:$24 sps:$4 sm:$0xff]  }
  0x3d   :  { %v1354_v61 = vld [vmem:[#allocation6 + $0x184] ss:$24 sps:$4 sm:$0xff]   ;;  %v1358_v63 = vld [vmem:[#allocation6 + $0x180] ss:$24 sps:$4 sm:$0xff]   ;;  %v1368_v4 = vld [vmem:[#allocation6 + $0x134] ss:$24 sps:$4 sm:$0xff]  }
  0x3e   :  { %717 = vmatpush1.bf16.msra.mxu0 %v1298_v22  ;;  %v1359_v0 = vld [vmem:[#allocation6 + $0x188] ss:$24 sps:$4 sm:$0xff]   ;;  %v1365_v1 = vld [vmem:[#allocation6 + $0x164] ss:$24 sps:$4 sm:$0xff]   ;;  %v1548_v8 = vld [vmem:[#allocation3 + $0x10] ss:$8 sps:$4 sm:$0xff]  }
  0x3f   :  { %770 = vmatpush1.bf16.msra.mxu1 %v1299_v23  ;;  %718 = vmatprep.subr.bf16.mxu0 %v1300_v24  ;;  %v1544_v2 = vld [vmem:[#allocation3] ss:$8 sps:$4 sm:$0xff]   ;;  %v1402_v5 = vld [vmem:[#allocation3 + $0x14] ss:$8 sps:$4 sm:$0xff]   ;;  %s1507_s0 = smov [#allocation9]  }
  0x40   :  { %771 = vmatprep.subr.bf16.mxu1 %v1302_v25  ;;  %v1363_v3 = vld [vmem:[#allocation6 + $0x160] ss:$24 sps:$4 sm:$0xff]   ;;  %v1366_v6 = vld [vmem:[#allocation6 + $0x130] ss:$24 sps:$4 sm:$0xff]   ;;  %v1371_v7 = vld [vmem:[#allocation6 + $0x104] ss:$24 sps:$4 sm:$0xff]  }
  0x41   :  { %v1369_v9 = vld [vmem:[#allocation6 + $0x100] ss:$24 sps:$4 sm:$0xff]   ;;  %v1374_v10 = vld [vmem:[#allocation6 + $0xd4] ss:$24 sps:$4 sm:$0xff]   ;;  %v1372_v11 = vld [vmem:[#allocation6 + $0xd0] ss:$24 sps:$4 sm:$0xff]  }
  0x42   :  { %719 = vmatpush1.bf16.msra.mxu0 %v1304_v26  ;;  %v1377_v12 = vld [vmem:[#allocation6 + $0xa4] ss:$24 sps:$4 sm:$0xff]   ;;  %v1375_v13 = vld [vmem:[#allocation6 + $0xa0] ss:$24 sps:$4 sm:$0xff]   ;;  %v1380_v14 = vld [vmem:[#allocation6 + $0x74] ss:$24 sps:$4 sm:$0xff]  }
  0x43   :  { %772 = vmatpush1.bf16.msra.mxu1 %v1305_v27  ;;  %720 = vmatprep.subr.bf16.mxu0 %v1306_v28  ;;  %v1378_v15 = vld [vmem:[#allocation6 + $0x70] ss:$24 sps:$4 sm:$0xff]   ;;  %v1383_v16 = vld [vmem:[#allocation6 + $0x44] ss:$24 sps:$4 sm:$0xff]   ;;  %v1381_v17 = vld [vmem:[#allocation6 + $0x40] ss:$24 sps:$4 sm:$0xff]  }
  0x44   :  { %773 = vmatprep.subr.bf16.mxu1 %v1308_v29  ;;  %v1386_v18 = vld [vmem:[#allocation6 + $0x14] ss:$24 sps:$4 sm:$0xff]   ;;  %v1384_v19 = vld [vmem:[#allocation6 + $0x10] ss:$24 sps:$4 sm:$0xff]   ;;  %v1389_v20 = vld [vmem:[#allocation6 + $0x2e4] ss:$24 sps:$4 sm:$0xff]  }
  0x45   :  { %v1387_v21 = vld [vmem:[#allocation6 + $0x2e0] ss:$24 sps:$4 sm:$0xff]   ;;  %v1392_v22 = vld [vmem:[#allocation6 + $0x2b4] ss:$24 sps:$4 sm:$0xff]   ;;  %v1390_v23 = vld [vmem:[#allocation6 + $0x2b0] ss:$24 sps:$4 sm:$0xff]  }
  0x46   :  { %721 = vmatpush1.bf16.msra.mxu0 %v1310_v30  ;;  %v1395_v24 = vld [vmem:[#allocation6 + $0x284] ss:$24 sps:$4 sm:$0xff]   ;;  %v1393_v25 = vld [vmem:[#allocation6 + $0x280] ss:$24 sps:$4 sm:$0xff]   ;;  %v1398_v26 = vld [vmem:[#allocation6 + $0x254] ss:$24 sps:$4 sm:$0xff]  }
  0x47   :  { %774 = vmatpush1.bf16.msra.mxu1 %v1311_v31  ;;  %722 = vmatprep.subr.bf16.mxu0 %v1312_v32  ;;  %v1396_v27 = vld [vmem:[#allocation6 + $0x250] ss:$24 sps:$4 sm:$0xff]   ;;  %v1401_v28 = vld [vmem:[#allocation6 + $0x224] ss:$24 sps:$4 sm:$0xff]   ;;  %v1399_v29 = vld [vmem:[#allocation6 + $0x220] ss:$24 sps:$4 sm:$0xff]  }
  0x48   :  { %775 = vmatprep.subr.bf16.mxu1 %v1314_v33  ;;  %v1407_v30 = vld [vmem:[#allocation6 + $0x1f4] ss:$24 sps:$4 sm:$0xff]   ;;  %v1405_v31 = vld [vmem:[#allocation6 + $0x1f0] ss:$24 sps:$4 sm:$0xff]   ;;  %v1410_v32 = vld [vmem:[#allocation6 + $0x1c4] ss:$24 sps:$4 sm:$0xff]  }
  0x49   :  { %v1408_v33 = vld [vmem:[#allocation6 + $0x1c0] ss:$24 sps:$4 sm:$0xff]   ;;  %s1087_s2 = sshll.u32 %s1507_s0, 4  ;;  %s1088_s2 = int_to_ptr.vmem [resolvable:$true] %s1087_s2 }
  0x4a   :  { %723 = vmatpush2.bf16.msra.mxu0 %v1316_v34  ;;  %v1413_v34 = vld [vmem:[#allocation6 + $0x194] ss:$24 sps:$4 sm:$0xff]   ;;  %s1474_s30 = scalar_lea.vmem %s1088_s2, 1536  ;;  %p1479_p2 = scmp.lt.s32.totalorder %s1088_s2, %s1088_s2 }
  0x4b   :  { %776 = vmatpush2.bf16.msra.mxu1 %v1317_v35  ;;  %724 = vmatprep.subr.bf16.mxu0 %v1318_v36  ;;  %v1411_v35 = vld [vmem:[#allocation6 + $0x190] ss:$24 sps:$4 sm:$0xff]   ;;  %v942_v36 = vlaneseq  ;;  %p1475_p1 = scmp.ne.s32.totalorder %s1088_s2, %s1474_s30  ;;  %p1480_p3 = scmp.lt.s32.totalorder %s1474_s30, %s1474_s30 }
  0x4c   :  { %777 = vmatprep.subr.bf16.mxu1 %v1320_v37 }
  0x4d   :  { %v943_v37 = vshrl.u32 %v942_v36, 7  ;;  %p1481_p4 = por %p1480_p3, %p1479_p2 }
  0x4e   :  { %725 = vmatpush2.bf16.msra.mxu0 %v1322_v38 }
  0x4f   :  { %778 = vmatpush2.bf16.msra.mxu1 %v1323_v39  ;;  %726 = vmatprep.subr.bf16.mxu0 %v1324_v40  ;;  %v960_v38 = vsub.s32 4, %v943_v37  ;;  %v940_v39 = vld [vmem:[#allocation8] sm:$0x3f]  ;;  %p1482_p5 = pnand %p1481_p4, %p1475_p1 }
  0x50   :  { %779 = vmatprep.subr.bf16.mxu1 %v1326_v41  ;;  %v964_v41 = vsub.s32 5, %v943_v37 }
  0x51   :  { %v1555_v40 = vrot.slane %v940_v39, %v960_v38 }
  0x52   :  { %727 = vmatpush2.bf16.msra.mxu0 %v1328_v42  ;;  %v1557_v42 = vrot.slane %v940_v39, %v964_v41 }
  0x53   :  { %780 = vmatpush2.bf16.msra.mxu1 %v1329_v43  ;;  %728 = vmatprep.subr.bf16.mxu0 %v1330_v44  ;;  %v944_v43 = vsub.s32 0, %v943_v37  ;;  %v952_v44 = vsub.s32 2, %v943_v37 }
  0x54   :  { %781 = vmatprep.subr.bf16.mxu1 %v1332_v45  ;;  %v948_v45 = vsub.s32 1, %v943_v37 }
  0x56   :  { %729 = vmatpush2.bf16.msra.mxu0 %v1334_v46  ;;  %v956_v46 = vsub.s32 3, %v943_v37 }
  0x57   :  { %782 = vmatpush2.bf16.msra.mxu1 %v1335_v47  ;;  %730 = vmatprep.subr.bf16.mxu0 %v1336_v49  ;;  %v945_v47 = vrot.slane %v940_v39, %v944_v43  ;;  %v949_v49 = vrot.slane %v940_v39, %v948_v45 }
  0x58   :  { %783 = vmatprep.subr.bf16.mxu1 %v1338_v50  ;;  %v957_v50 = vrot.slane %v940_v39, %v956_v46 }
  0x5a   :  { %731 = vmatpush2.bf16.msra.mxu0 %v1340_v51 }
  0x5b   :  { %784 = vmatpush2.bf16.msra.mxu1 %v1341_v52  ;;  %732 = vmatprep.subr.bf16.mxu0 %v1342_v53 }
  0x5c   :  { %785 = vmatprep.subr.bf16.mxu1 %v1344_v54 }
  0x5e   :  { %733 = vmatpush2.bf16.msra.mxu0 %v1346_v55 }
  0x5f   :  { %786 = vmatpush2.bf16.msra.mxu1 %v1347_v56  ;;  %734 = vmatprep.subr.bf16.mxu0 %v1348_v57 }
  0x60   :  { %787 = vmatprep.subr.bf16.mxu1 %v1350_v58 }
  0x62   :  { %735 = vmatpush2.bf16.msra.mxu0 %v1352_v59 }
  0x63   :  { %788 = vmatpush2.bf16.msra.mxu1 %v1353_v60  ;;  %736 = vmatprep.subr.bf16.mxu0 %v1354_v61 }
  0x64   :  { %789 = vmatprep.subr.bf16.mxu1 %v1356_v62 }
  0x66   :  { %737 = vmatpush2.bf16.msra.mxu0 %v1358_v63 }
  0x67   :  { %790 = vmatpush2.bf16.msra.mxu1 %v1359_v0  ;;  %812 = vmatprep.subr.bf16.mxu0 %v1365_v1 }
  0x68   :  { %1224 = vmatprep.subr.bf16.mxu1 %v1365_v1 }
  0x69   :  { %739 = vmatmul.mubr.bf16.vlgmr.msra.gmra.mxu0 %v1544_v2 }
  0x6a   :  { %792 = vmatmul.mubr.bf16.vlgmr.msra.gmra.mxu1 %v1544_v2  ;;  %813 = vmatpush1.bf16.msra.mxu0 %v1363_v3 }
  0x6b   :  { %1240 = vmatpush1.bf16.msra.mxu1 %v1363_v3  ;;  %814 = vmatprep.subr.bf16.mxu0 %v1368_v4 }
  0x6c   :  { %1225 = vmatprep.subr.bf16.mxu1 %v1368_v4  ;;  %748 = vmatprep.mubr.bf16.mxu0 %v1402_v5 }
  0x6d   :  { %801 = vmatprep.mubr.bf16.mxu1 %v1402_v5 }
  0x6e   :  { %815 = vmatpush1.bf16.msra.mxu0 %v1366_v6 }
  0x6f   :  { %1241 = vmatpush1.bf16.msra.mxu1 %v1366_v6  ;;  %816 = vmatprep.subr.bf16.mxu0 %v1371_v7 }
  0x70   :  { %1226 = vmatprep.subr.bf16.mxu1 %v1371_v7 }
  0x71   :  { %749 = vmatmul.mubr.bf16.gmra.mxu0 %v1548_v8 }
  0x72   :  { %802 = vmatmul.mubr.bf16.gmra.mxu1 %v1548_v8  ;;  %817 = vmatpush1.bf16.msra.mxu0 %v1369_v9 }
  0x73   :  { %1242 = vmatpush1.bf16.msra.mxu1 %v1369_v9  ;;  %818 = vmatprep.subr.bf16.mxu0 %v1374_v10 }
  0x74   :  { %1227 = vmatprep.subr.bf16.mxu1 %v1374_v10  ;;  %844 = vmatprep.mubr.bf16.mxu0 %v1540_v48  ;;  %v953_v48 = vrot.slane %v940_v39, %v952_v44 }
  0x75   :  { %854 = vmatprep.mubr.bf16.mxu1 %v1402_v5 }
  0x76   :  { %819 = vmatpush1.bf16.msra.mxu0 %v1372_v11 }
  0x77   :  { %1243 = vmatpush1.bf16.msra.mxu1 %v1372_v11  ;;  %820 = vmatprep.subr.bf16.mxu0 %v1377_v12 }
  0x78   :  { %1228 = vmatprep.subr.bf16.mxu1 %v1377_v12 }
  0x7a   :  { %821 = vmatpush1.bf16.msra.mxu0 %v1375_v13 }
  0x7b   :  { %1244 = vmatpush1.bf16.msra.mxu1 %v1375_v13  ;;  %822 = vmatprep.subr.bf16.mxu0 %v1380_v14 }
  0x7c   :  { %1229 = vmatprep.subr.bf16.mxu1 %v1380_v14 }
  0x7e   :  { %823 = vmatpush1.bf16.msra.mxu0 %v1378_v15 }
  0x7f   :  { %1245 = vmatpush1.bf16.msra.mxu1 %v1378_v15  ;;  %824 = vmatprep.subr.bf16.mxu0 %v1383_v16 }
  0x80   :  { %1230 = vmatprep.subr.bf16.mxu1 %v1383_v16 }
  0x82   :  { %825 = vmatpush1.bf16.msra.mxu0 %v1381_v17 }
  0x83   :  { %1246 = vmatpush1.bf16.msra.mxu1 %v1381_v17  ;;  %826 = vmatprep.subr.bf16.mxu0 %v1386_v18 }
  0x84   :  { %1231 = vmatprep.subr.bf16.mxu1 %v1386_v18 }
  0x86   :  { %827 = vmatpush1.bf16.msra.mxu0 %v1384_v19 }
  0x87   :  { %1247 = vmatpush1.bf16.msra.mxu1 %v1384_v19  ;;  %828 = vmatprep.subr.bf16.mxu0 %v1389_v20 }
  0x88   :  { %1232 = vmatprep.subr.bf16.mxu1 %v1389_v20 }
  0x8a   :  { %829 = vmatpush2.bf16.msra.mxu0 %v1387_v21 }
  0x8b   :  { %1248 = vmatpush2.bf16.msra.mxu1 %v1387_v21  ;;  %830 = vmatprep.subr.bf16.mxu0 %v1392_v22 }
  0x8c   :  { %1233 = vmatprep.subr.bf16.mxu1 %v1392_v22 }
  0x8e   :  { %831 = vmatpush2.bf16.msra.mxu0 %v1390_v23 }
  0x8f   :  { %1249 = vmatpush2.bf16.msra.mxu1 %v1390_v23  ;;  %832 = vmatprep.subr.bf16.mxu0 %v1395_v24 }
  0x90   :  { %1234 = vmatprep.subr.bf16.mxu1 %v1395_v24 }
  0x92   :  { %833 = vmatpush2.bf16.msra.mxu0 %v1393_v25 }
  0x93   :  { %1250 = vmatpush2.bf16.msra.mxu1 %v1393_v25  ;;  %834 = vmatprep.subr.bf16.mxu0 %v1398_v26 }
  0x94   :  { %1235 = vmatprep.subr.bf16.mxu1 %v1398_v26 }
  0x96   :  { %835 = vmatpush2.bf16.msra.mxu0 %v1396_v27 }
  0x97   :  { %1251 = vmatpush2.bf16.msra.mxu1 %v1396_v27  ;;  %836 = vmatprep.subr.bf16.mxu0 %v1401_v28 }
  0x98   :  { %1236 = vmatprep.subr.bf16.mxu1 %v1401_v28 }
  0x9a   :  { %837 = vmatpush2.bf16.msra.mxu0 %v1399_v29 }
  0x9b   :  { %1252 = vmatpush2.bf16.msra.mxu1 %v1399_v29  ;;  %838 = vmatprep.subr.bf16.mxu0 %v1407_v30 }
  0x9c   :  { %1237 = vmatprep.subr.bf16.mxu1 %v1407_v30 }
  0x9e   :  { %839 = vmatpush2.bf16.msra.mxu0 %v1405_v31 }
  0x9f   :  { %1253 = vmatpush2.bf16.msra.mxu1 %v1405_v31  ;;  %840 = vmatprep.subr.bf16.mxu0 %v1410_v32 }
  0xa0   :  { %1238 = vmatprep.subr.bf16.mxu1 %v1410_v32 }
  0xa2   :  { %841 = vmatpush2.bf16.msra.mxu0 %v1408_v33 }
  0xa3   :  { %1254 = vmatpush2.bf16.msra.mxu1 %v1408_v33  ;;  %842 = vmatprep.subr.bf16.mxu0 %v1413_v34 }
  0xa4   :  { %1239 = vmatprep.subr.bf16.mxu1 %v1413_v34 }
  0xa6   :  { %843 = vmatpush2.bf16.msra.mxu0 %v1411_v35 }
  0xa7   :  { %1255 = vmatpush2.bf16.msra.mxu1 %v1411_v35 }
  0xa9   :  { %845 = vmatmul.mubr.bf16.vlgmr.msra.gmra.mxu0 %v1544_v2 }
  0xaa   :  { %855 = vmatmul.mubr.bf16.vlgmr.msra.gmra.mxu1 %v1548_v8 }
 0x129   :  { %v740_v51 = vpop.f32.mrf.mxu0 }
 0x12a   :  { %v793_v52 = vpop.f32.mrf.mxu1  ;;  %v972_v53 = vadd.f32 %v945_v47, %v740_v51 }
 0x12b   :  { %v974_v54 = vadd.f32 %v953_v48, %v793_v52  ;;  %v742_v55 = vpop.f32.mrf.mxu0 }
 0x12c   :  { %v795_v56 = vpop.f32.mrf.mxu1  ;;  %v973_v57 = vadd.f32 %v949_v49, %v742_v55 }
 0x12d   :  { %v975_v58 = vadd.f32 %v957_v50, %v795_v56  ;;  %v744_v59 = vpop.f32.mrf.mxu0 }
 0x12e   :  { %v797_v60 = vpop.f32.mrf.mxu1  ;;  %v1212_v61 = vpack.c.bf16 %v973_v57, %v972_v53  ;;  %v978_v1 = vadd.f32 %v945_v47, %v744_v59 }
 0x12f   :  { %v1216_v62 = vpack.c.bf16 %v975_v58, %v974_v54  ;;  %v746_v63 = vpop.f32.mrf.mxu0  ;;  %v980_v2 = vadd.f32 %v953_v48, %v797_v60 }
 0x130   :  { %v799_v0 = vpop.f32.mrf.mxu1  ;;  %1020 = vst [vmem:[#allocation9] sm:$0xff] %v1212_v61  ;;  %v979_v3 = vadd.f32 %v949_v49, %v746_v63 }
 0x131   :  { %1049 = vst [vmem:[#allocation9 + $0x20] sm:$0xff] %v1216_v62  ;;  %v981_v4 = vadd.f32 %v957_v50, %v799_v0  ;;  %v750_v5 = vpop.f32.mrf.mxu0 }
 0x132   :  { %v803_v6 = vpop.f32.mrf.mxu1  ;;  %v1213_v7 = vpack.c.bf16 %v979_v3, %v978_v1  ;;  %v984_v9 = vadd.f32 %v945_v47, %v750_v5 }
 0x133   :  { %v1217_v8 = vpack.c.bf16 %v981_v4, %v980_v2  ;;  %v986_v10 = vadd.f32 %v953_v48, %v803_v6  ;;  %v752_v11 = vpop.f32.mrf.mxu0 }
 0x134   :  { %v805_v12 = vpop.f32.mrf.mxu1  ;;  %1021 = vst [vmem:[#allocation9 + $0x8] sm:$0xff] %v1213_v7  ;;  %v985_v13 = vadd.f32 %v949_v49, %v752_v11 }
 0x135   :  { %1050 = vst [vmem:[#allocation9 + $0x28] sm:$0xff] %v1217_v8  ;;  %v987_v14 = vadd.f32 %v957_v50, %v805_v12  ;;  %v754_v15 = vpop.f32.mrf.mxu0 }
 0x136   :  { %v807_v16 = vpop.f32.mrf.mxu1  ;;  %v1214_v17 = vpack.c.bf16 %v985_v13, %v984_v9  ;;  %v990_v19 = vadd.f32 %v945_v47, %v754_v15 }
 0x137   :  { %v1218_v18 = vpack.c.bf16 %v987_v14, %v986_v10  ;;  %v992_v20 = vadd.f32 %v953_v48, %v807_v16  ;;  %v756_v21 = vpop.f32.mrf.mxu0 }
 0x138   :  { %v809_v22 = vpop.f32.mrf.mxu1  ;;  %1022 = vst [vmem:[#allocation9 + $0x10] sm:$0xff] %v1214_v17  ;;  %v991_v23 = vadd.f32 %v949_v49, %v756_v21 }
 0x139   :  { %1051 = vst [vmem:[#allocation9 + $0x30] sm:$0xff] %v1218_v18  ;;  %v993_v24 = vadd.f32 %v957_v50, %v809_v22 }
 0x13a   :  { %v1215_v25 = vpack.c.bf16 %v991_v23, %v990_v19 }
 0x13b   :  { %v1219_v26 = vpack.c.bf16 %v993_v24, %v992_v20 }
 0x13c   :  { %1023 = vst [vmem:[#allocation9 + $0x18] sm:$0xff] %v1215_v25 }
 0x13d   :  { %1052 = vst [vmem:[#allocation9 + $0x38] sm:$0xff] %v1219_v26 }
 0x169   :  { %v846_v27 = vpop.f32.mrf.mxu0 }
 0x16a   :  { %v856_v28 = vpop.f32.mrf.mxu1  ;;  %v976_v31 = vadd.f32 %v1555_v40, %v846_v27 }
 0x16b   :  { %v848_v29 = vpop.f32.mrf.mxu0  ;;  %v988_v32 = vadd.f32 %v1555_v40, %v856_v28 }
 0x16c   :  { %v858_v30 = vpop.f32.mrf.mxu1  ;;  %v977_v33 = vadd.f32 %v1557_v42, %v848_v29 }
 0x16d   :  { %v989_v34 = vadd.f32 %v1557_v42, %v858_v30  ;;  %v850_v35 = vpop.f32.mrf.mxu0 }
 0x16e   :  { %v860_v36 = vpop.f32.mrf.mxu1  ;;  %v1220_v37 = vpack.c.bf16 %v977_v33, %v976_v31  ;;  %v982_v43 = vadd.f32 %v1555_v40, %v850_v35 }
 0x16f   :  { %v1222_v38 = vpack.c.bf16 %v989_v34, %v988_v32  ;;  %v852_v39 = vpop.f32.mrf.mxu0  ;;  %v994_v44 = vadd.f32 %v1555_v40, %v860_v36 }
 0x170   :  { %v862_v41 = vpop.f32.mrf.mxu1  ;;  %1078 = vst [vmem:[#allocation9 + $0x40] sm:$0xff] %v1220_v37  ;;  %v983_v45 = vadd.f32 %v1557_v42, %v852_v39 }
 0x171   :  { %1080 = vst [vmem:[#allocation9 + $0x50] sm:$0xff] %v1222_v38  ;;  %v995_v46 = vadd.f32 %v1557_v42, %v862_v41 }
 0x172   :  { %v1221_v47 = vpack.c.bf16 %v983_v45, %v982_v43 }
 0x173   :  { %v1223_v48 = vpack.c.bf16 %v995_v46, %v994_v44 }
 0x174   :  { %1079 = vst [vmem:[#allocation9 + $0x48] sm:$0xff] %v1221_v47 }
 0x175   :  { %1081 = vst [vmem:[#allocation9 + $0x58] sm:$0xff] %v1223_v48 }
 0x176   :  { %1485 = shalt.err (!%p1482_p5)
}
 0x177   :  { %1093 = dma.vmem_to_hbm [thread:$0]  %s1088_s2, 1536, %s1576_s3, [#allocation5], %s1504_s22, %s1504_s22, %s1505_s23  }
 0x178   :  { %1498 = dma.done.wait [#allocation5], 1536  }
 0x179   :  { %1499 = vsyncadd [#allocation5], 4294965760 }
 0x17a   :  { %1097 = vsyncpa [#allocation4], 1 }
 0x17b   :  { %1098 = vsyncpa [#allocation7], 1 }
 0x17c   :  { %1099 = vsyncpa [#allocation5], 1 }

</bundles_post_ra>
